<compile_context>
chip_gen: v7x
topology: tpu7x:2x2x1
jax: 0.10.0
libtpu: 0.0.40
codegen_flags: <defaults>
</compile_context>

<pallas_src>
import functools

import jax
import jax.numpy as jnp
from jax.experimental import pallas as pl
from jax.experimental.pallas import tpu as pltpu


def _focal_loss_kernel(logits_ref, targets_ref, out_ref, *, gamma: float,
                       n_total: int, mask_rows: bool):
    # logits_ref: (TILE_N, C) float, targets_ref: (TILE_N, 1) int32,
    # out_ref:    (1, 1) float32 -- resident accumulator across the grid.
    i = pl.program_id(0)

    @pl.when(i == 0)
    def _init():
        out_ref[...] = jnp.zeros_like(out_ref)

    logits = logits_ref[...].astype(jnp.float32)          # (TILE_N, C)
    tgt = targets_ref[...]                                 # (TILE_N, 1) int32
    tn, c = logits.shape

    # --- per-row cross entropy: logsumexp - logits[target] ---
    row_max = jnp.max(logits, axis=-1, keepdims=True)                       # (TILE_N, 1)
    lse = jnp.log(jnp.sum(jnp.exp(logits - row_max), axis=-1,
                          keepdims=True)) + row_max                         # (TILE_N, 1)
    class_ids = jax.lax.broadcasted_iota(jnp.int32, (tn, c), 1)             # (TILE_N, C)
    tgt_logit = jnp.sum(jnp.where(class_ids == tgt, logits, 0.0),
                        axis=-1, keepdims=True)                             # (TILE_N, 1)
    ce_per_row = lse - tgt_logit                                            # (TILE_N, 1)

    if mask_rows:
        # Zero out contributions from padded rows of the (zero-padded) last tile.
        row_ids = jax.lax.broadcasted_iota(jnp.int32, (tn, 1), 0) + i * tn
        ce_per_row = jnp.where(row_ids < n_total, ce_per_row, 0.0)

    # Accumulate the partial CE sum into the resident output block.
    out_ref[...] += jnp.sum(ce_per_row, axis=0, keepdims=True)              # (1, 1)

    @pl.when(i == pl.num_programs(0) - 1)
    def _finalize():
        ce = out_ref[...] * (1.0 / n_total)     # mean CE over the true batch
        pt = jnp.exp(-ce)
        omp = 1.0 - pt
        g = float(gamma)
        if g == 2.0:                            # default gamma: just a multiply
            w = omp * omp
        elif g.is_integer() and g >= 0:
            w = jnp.ones_like(omp)
            for _ in range(int(g)):
                w = w * omp
        else:
            w = omp ** g                        # general float gamma (log/exp on EUP)
        out_ref[...] = w * ce


def _round_up(x: int, m: int) -> int:
    return ((x + m - 1) // m) * m


def focal_loss(logits: jax.Array, targets: jax.Array, gamma: float = 2.0,
               tile_n: int | None = None) -> jax.Array:
    """logits: (N, C) float (f32 or bf16); targets: (N,) int class indices. Returns scalar."""
    n, c = logits.shape

    if tile_n is None:
        # Keep the f32 compute tile around 2 MiB; double-buffered inputs plus
        # in-kernel temporaries then fit comfortably on v5e/v6e (128 MiB VMEM)
        # and v7x (64 MiB VMEM).
        tile_n = max(8, (2 * 1024 * 1024) // (c * 4))
    tile_n = max(8, (int(tile_n) // 8) * 8)      # sublane multiple of 8
    tile_n = min(tile_n, _round_up(n, 8))

    n_pad = _round_up(n, tile_n)
    targets2d = targets.reshape(n, 1).astype(jnp.int32)
    logits_p = logits
    if n_pad != n:
        logits_p = jnp.pad(logits, ((0, n_pad - n), (0, 0)))
        targets2d = jnp.pad(targets2d, ((0, n_pad - n), (0, 0)))
    num_tiles = n_pad // tile_n

    kernel = functools.partial(
        _focal_loss_kernel,
        gamma=float(gamma),
        n_total=n,
        mask_rows=(n_pad != n),
    )

    out = pl.pallas_call(
        kernel,
        out_shape=jax.ShapeDtypeStruct((1, 1), jnp.float32),
        grid=(num_tiles,),
        in_specs=[
            pl.BlockSpec((tile_n, c), lambda i: (i, 0)),
            pl.BlockSpec((tile_n, 1), lambda i: (i, 0)),
        ],
        out_specs=pl.BlockSpec((1, 1), lambda i: (0, 0)),
        compiler_params=pltpu.CompilerParams(
            dimension_semantics=("arbitrary",),      # batch axis is a reduction
            vmem_limit_bytes=32 * 1024 * 1024,
        ),
    )(logits_p, targets2d)
    return out[0, 0]


def _focal_loss_ref(logits, targets, gamma=2.0):
    logp = jax.nn.log_softmax(logits.astype(jnp.float32), axis=-1)
    nll = -jnp.take_along_axis(logp, targets[:, None].astype(jnp.int32), axis=-1)[:, 0]
    ce = jnp.mean(nll)
    pt = jnp.exp(-ce)
    return (1.0 - pt) ** gamma * ce


if __name__ == "__main__":
    key = jax.random.PRNGKey(0)
    k1, k2 = jax.random.split(key)

    # Small classification-style shapes; N=60 with tile_n=16 exercises a
    # multi-step pipelined grid plus a ragged (padded + masked) last tile.
    N, C = 60, 16
    logits = jax.random.normal(k1, (N, C), dtype=jnp.float32)
    targets = jax.random.randint(k2, (N,), 0, C, dtype=jnp.int32)

    out = jax.block_until_ready(focal_loss(logits, targets, gamma=2.0, tile_n=16))
    ref = _focal_loss_ref(logits, targets, gamma=2.0)
    assert jnp.allclose(out, ref, rtol=1e-5, atol=1e-5), (out, ref)

    # bf16 logits in HBM (halves HBM bytes); kernel upcasts to f32 in VMEM.
    logits_bf16 = logits.astype(jnp.bfloat16)
    out_bf = jax.block_until_ready(focal_loss(logits_bf16, targets, gamma=2.0))
    ref_bf = _focal_loss_ref(logits_bf16, targets, gamma=2.0)
    assert jnp.allclose(out_bf, ref_bf, rtol=1e-4, atol=1e-4), (out_bf, ref_bf)

    print("KERNEL_OK")
</pallas_src>

<mosaic_0001>
module attributes {stable_mosaic.version = 11 : i64} {
  func.func @_focal_loss_kernel(%arg0: i32, %arg1: memref<16x16xf32, #tpu.memory_space<vmem>>, %arg2: memref<16x1xi32, #tpu.memory_space<vmem>>, %arg3: memref<1x1xf32, #tpu.memory_space<vmem>>) attributes {dimension_semantics = [#tpu.dimension_semantics<arbitrary>], iteration_bounds = array<i64: 4>, scalar_prefetch = 0 : i64, scratch_operands = 0 : i64, tpu.core_type = #tpu.core_type<tc>, window_params = [{transform_indices = @transform_0, window_bounds = array<i64: 16, 16>}, {transform_indices = @transform_1, window_bounds = array<i64: 16, 1>}, {pipeline_mode = #tpu.pipeline_mode<synchronous>, transform_indices = @transform_2, window_bounds = array<i64: 1, 1>}]} {
    %c0_i32 = arith.constant 0 : i32
    %0 = arith.cmpi eq, %arg0, %c0_i32 : i32
    %1 = arith.extui %0 : i1 to i32
    %c0_i32_0 = arith.constant 0 : i32
    %2 = arith.cmpi ne, %1, %c0_i32_0 : i32
    scf.if %2 {
      %cst_14 = arith.constant 0.000000e+00 : f32
      %38 = vector.broadcast %cst_14 : f32 to vector<1x1xf32>
      %c0_15 = arith.constant 0 : index
      %c0_16 = arith.constant 0 : index
      %39 = vector.load %arg3[%c0_15, %c0_16] : memref<1x1xf32, #tpu.memory_space<vmem>>, vector<1x1xf32>
      tpu.vector_store %arg3[%c0_15, %c0_16], %38 {strides = array<i32>} : memref<1x1xf32, #tpu.memory_space<vmem>>, vector<1x1xf32>,
    } else {
    }
    %c0 = arith.constant 0 : index
    %c0_1 = arith.constant 0 : index
    %3 = vector.load %arg1[%c0, %c0_1] : memref<16x16xf32, #tpu.memory_space<vmem>>, vector<16x16xf32>
    %c0_2 = arith.constant 0 : index
    %c0_3 = arith.constant 0 : index
    %4 = vector.load %arg2[%c0_2, %c0_3] : memref<16x1xi32, #tpu.memory_space<vmem>>, vector<16x1xi32>
    %cst = arith.constant dense<0xFF800000> : vector<16xf32>
    %5 = vector.multi_reduction <maximumf>, %3, %cst [1] : vector<16x16xf32> to vector<16xf32>
    %6 = vector.shape_cast %5 : vector<16xf32> to vector<16x1xf32>
    %7 = vector.broadcast %6 : vector<16x1xf32> to vector<16x16xf32>
    %8 = arith.subf %3, %7 : vector<16x16xf32>
    %9 = math.exp %8 : vector<16x16xf32>
    %cst_4 = arith.constant dense<0.000000e+00> : vector<16xf32>
    %10 = vector.multi_reduction <add>, %9, %cst_4 [1] : vector<16x16xf32> to vector<16xf32>
    %11 = vector.shape_cast %10 : vector<16xf32> to vector<16x1xf32>
    %12 = math.log %11 : vector<16x1xf32>
    %13 = arith.addf %12, %6 : vector<16x1xf32>
    %14 = tpu.iota {dimensions = array<i32: 1>} : vector<16x16xi32>
    %15 = vector.broadcast %4 : vector<16x1xi32> to vector<16x16xi32>
    %16 = arith.cmpi eq, %14, %15 : vector<16x16xi32>
    %cst_5 = arith.constant 0.000000e+00 : f32
    %17 = vector.broadcast %cst_5 : f32 to vector<16x16xf32>
    %18 = arith.select %16, %3, %17 : vector<16x16xi1>, vector<16x16xf32>
    %cst_6 = arith.constant dense<0.000000e+00> : vector<16xf32>
    %19 = vector.multi_reduction <add>, %18, %cst_6 [1] : vector<16x16xf32> to vector<16xf32>
    %20 = vector.shape_cast %19 : vector<16xf32> to vector<16x1xf32>
    %21 = arith.subf %13, %20 : vector<16x1xf32>
    %22 = tpu.iota {dimensions = array<i32: 0>} : vector<16x1xi32>
    %c16_i32 = arith.constant 16 : i32
    %23 = arith.muli %arg0, %c16_i32 : i32
    %24 = vector.broadcast %23 : i32 to vector<16x1xi32>
    %25 = arith.addi %22, %24 : vector<16x1xi32>
    %c60_i32 = arith.constant 60 : i32
    %26 = vector.broadcast %c60_i32 : i32 to vector<16x1xi32>
    %27 = arith.cmpi slt, %25, %26 : vector<16x1xi32>
    %cst_7 = arith.constant 0.000000e+00 : f32
    %28 = vector.broadcast %cst_7 : f32 to vector<16x1xf32>
    %29 = arith.select %27, %21, %28 : vector<16x1xi1>, vector<16x1xf32>
    %c0_8 = arith.constant 0 : index
    %c0_9 = arith.constant 0 : index
    %30 = vector.load %arg3[%c0_8, %c0_9] : memref<1x1xf32, #tpu.memory_space<vmem>>, vector<1x1xf32>
    %cst_10 = arith.constant dense<0.000000e+00> : vector<1xf32>
    %31 = vector.multi_reduction <add>, %29, %cst_10 [0] : vector<16x1xf32> to vector<1xf32>
    %32 = vector.shape_cast %31 : vector<1xf32> to vector<1x1xf32>
    %33 = arith.addf %30, %32 : vector<1x1xf32>
    %c0_11 = arith.constant 0 : index
    %c0_12 = arith.constant 0 : index
    %34 = vector.load %arg3[%c0_11, %c0_12] : memref<1x1xf32, #tpu.memory_space<vmem>>, vector<1x1xf32>
    tpu.vector_store %arg3[%c0_11, %c0_12], %33 {strides = array<i32>} : memref<1x1xf32, #tpu.memory_space<vmem>>, vector<1x1xf32>,
    %c3_i32 = arith.constant 3 : i32
    %35 = arith.cmpi eq, %arg0, %c3_i32 : i32
    %36 = arith.extui %35 : i1 to i32
    %c0_i32_13 = arith.constant 0 : i32
    %37 = arith.cmpi ne, %36, %c0_i32_13 : i32
    scf.if %37 {
      %c0_14 = arith.constant 0 : index
      %c0_15 = arith.constant 0 : index
      %38 = vector.load %arg3[%c0_14, %c0_15] : memref<1x1xf32, #tpu.memory_space<vmem>>, vector<1x1xf32>
      %cst_16 = arith.constant 0.0166666675 : f32
      %39 = vector.broadcast %cst_16 : f32 to vector<1x1xf32>
      %40 = arith.mulf %38, %39 : vector<1x1xf32>
      %cst_17 = arith.constant 0.000000e+00 : f32
      %41 = vector.broadcast %cst_17 : f32 to vector<1x1xf32>
      %42 = arith.subf %41, %40 : vector<1x1xf32>
      %43 = math.exp %42 : vector<1x1xf32>
      %cst_18 = arith.constant 1.000000e+00 : f32
      %44 = vector.broadcast %cst_18 : f32 to vector<1x1xf32>
      %45 = arith.subf %44, %43 : vector<1x1xf32>
      %46 = arith.mulf %45, %45 : vector<1x1xf32>
      %47 = arith.mulf %46, %40 : vector<1x1xf32>
      %c0_19 = arith.constant 0 : index
      %c0_20 = arith.constant 0 : index
      %48 = vector.load %arg3[%c0_19, %c0_20] : memref<1x1xf32, #tpu.memory_space<vmem>>, vector<1x1xf32>
      tpu.vector_store %arg3[%c0_19, %c0_20], %47 {strides = array<i32>} : memref<1x1xf32, #tpu.memory_space<vmem>>, vector<1x1xf32>,
    } else {
    }
    return
  }
  func.func @transform_0(%arg0: i32) -> (i32, i32) {
    %c0_i32 = arith.constant 0 : i32
    %c0_i32_0 = arith.constant 0 : i32
    return %arg0, %c0_i32 : i32, i32
  }
  func.func @transform_1(%arg0: i32) -> (i32, i32) {
    %c0_i32 = arith.constant 0 : i32
    %c0_i32_0 = arith.constant 0 : i32
    return %arg0, %c0_i32 : i32, i32
  }
  func.func @transform_2(%arg0: i32) -> (i32, i32) {
    %c0_i32 = arith.constant 0 : i32
    %c0_i32_0 = arith.constant 0 : i32
    %c0_i32_1 = arith.constant 0 : i32
    return %c0_i32, %c0_i32_0 : i32, i32
  }
}

</mosaic_0001>

<bundles_post_ra>
// kernel: tpu_custom_call.1
= control target key start
LH: loop header
LB: loop body
LE: loop exit
PB: predicated region body
PF: predicated region fallthrough
CT: control target
= control target key end

     0   :  { %7 = vsyncpa [#allocation3], 0  ;;  %s402_s9 = smov 0   ;;  %s454_s0 = inlined_call_operand.vmem [shape: f32[64,16], index: 0, kind: input, shape index: {}]   ;;  %s455_s1 = inlined_call_operand.vmem [shape: s32[64,1], index: 1, kind: input, shape index: {}]   ;;  %s456_s2 = inlined_call_operand.hbm [shape: f32[1,1], index: 2, kind: output, shape index: {}]  }
   0x1 LB: > { %s408_s10 = sadd.s32 4294967295, %s382_s9   ;;  %p305_p0 = scmp.ge.s32.totalorder %s382_s9, 1  ;;  %s382_s9 = sphi %s402_s9, %s13_s9  }
   0x2   : > { %p120_p1 = scmp.lt.s32.totalorder %s382_s9, 5 }
   0x4   : > { %p121_p2 = pnand %p305_p0, %p120_p1 }
   0x5   : > { %s306_s11 = sshll.u32 (!%p121_p2), %s408_s10, 1  ;;  %p310_p4 = scmp.ne.s32.totalorder (!%p121_p2), %s408_s10, 0 }
   0x6   : > { %124 = sbr.rel (%p121_p2) target bundleno = 417 (0x1a1), region = 28  ;;  %p143_p3 = scmp.lt.s32.totalorder (!%p121_p2), %s306_s11, 7 }
   0xd   : > { %s458_s11 = smov (!%p143_p3, %s306_s11), 7  ;;  %157 = sbr.rel (%p310_p4) target bundleno = 20 (0x14), region = 32 }
   0xe   : > { %s307_s12 = sshll.u32 %s458_s11, 3  ;;  %vm158_vm0 = vcmask (!%p310_p4), 0   ;;  %v384_v0 = vmov (!%p310_p4), 0.0  }
   0xf   : > { %s146_s15 = scalar_lea.vmem %s454_s0, %s307_s12  ;;  %s152_s18 = scalar_lea.vmem %s455_s1, %s307_s12  ;;  %159 = vst.msk [vmem:[#allocation2] sm:$0x1] (!%p310_p4), %vm158_vm0, %v384_v0 }
  0x14 PF: > { %v160_v1 = vld [vmem:[%s146_s15] sm:$0xff]  ;;  %vm164_vm1 = vcmask 130048   ;;  %v161_v2 = vld [vmem:[%s146_s15 + $0x8] sm:$0xff]  ;;  %v385_v5 = vmov 0   ;;  %v189_v12 = vlaneseq  ;;  %s311_s19 = sshll.u32 %s408_s10, 4  ;;  %vm229_vm6 = vcmask 0  }
  0x15   : > { %v162_v3 = vld [vmem:[%s152_s18] sm:$0xff]  ;;  %v165_v4 = vsel %vm164_vm1, %v160_v1, -inf  ;;  %334 = vset.pattern.permute.xlu1 %v385_v5  ;;  %335 = vset.pattern.permute.xlu0 %v385_v5  ;;  %v168_v6 = vsel %vm164_vm1, %v161_v2, -inf  ;;  %v163_v7 = vld [vmem:[%s152_s18 + $0x8] sm:$0xff]  ;;  %v213_v32 = vstv %s311_s19  ;;  %p312_p5 = scmp.ne.s32.totalorder %s408_s10, 3 }
  0x16   : > { %166 = vmax.xlane.f32.xlu0 %v165_v4  ;;  %192 = vperm.xlu1 %334, %v162_v3   ;;  %v190_v16 = vand.u32 127, %v189_v12  ;;  %v210_v28 = vshrl.u32 %v189_v12, 7  ;;  %v220_v51 = vld [vmem:[#allocation2] sm:$0x1] }
  0x18   : > { %v211_v30 = vadd.s32 8, %v210_v28  ;;  %v214_v36 = vadd.s32 %v213_v32, %v210_v28 }
  0x1a   : > { %169 = vmax.xlane.f32.xlu0 %v168_v6  ;;  %195 = vperm.xlu1 %334, %v163_v7   ;;  %v215_v37 = vadd.s32 %v213_v32, %v211_v30  ;;  %vm216_vm4 = vcmp.lt.s32.totalorder %v214_v36, 60 }
  0x1c   : > { %vm217_vm5 = vcmp.lt.s32.totalorder %v215_v37, 60 }
  0x95   : > { %v193_v15 = vpop.permute.xlu1 %192 }
  0x96   : > { %vm197_vm2 = vcmp.eq.s32.totalorder %v190_v16, %v193_v15 }
  0x97   : > { %v199_v19 = vsel %vm197_vm2, %v160_v1, 0.0 }
  0x98   : > { %v201_v21 = vsel %vm164_vm1, %v199_v19, 0.0 }
  0x99   : > { %v196_v17 = vpop.permute.xlu1 %195 }
  0x9a   : > { %vm198_vm3 = vcmp.eq.s32.totalorder %v190_v16, %v196_v17 }
  0x9b   : > { %v200_v23 = vsel %vm198_vm3, %v161_v2, 0.0 }
  0x9c   : > { %v204_v25 = vsel %vm164_vm1, %v200_v23, 0.0 }
  0xa3   : > { %v167_v8 = vpop.xlane.xlu0 %166 }
  0xa4   : > { %v171_v9 = vsub.f32 %v160_v1, %v167_v8 }
  0xa6   : > { %v173_v10 = vmul.f32 1.442695, %v171_v9 }
  0xa7   : > { %v170_v11 = vpop.xlane.xlu0 %169 }
  0xa8   : > { %336 = vpow2.f32 %v173_v10  ;;  %v172_v13 = vsub.f32 %v161_v2, %v170_v11 }
  0xaa   : > { %v175_v14 = vmul.f32 1.442695, %v172_v13 }
  0xac   : > { %338 = vpow2.f32 %v175_v14 }
  0xb2   : > { %v337_v18 = vpop.eup %336 }
  0xb3   : > { %v177_v20 = vsel %vm164_vm1, %v337_v18, 0.0 }
  0xb4   : > { %178 = vadd.xlane.f32.xlu0 %v177_v20 }
  0xb6   : > { %v339_v22 = vpop.eup %338 }
  0xb7   : > { %v180_v24 = vsel %vm164_vm1, %v339_v22, 0.0 }
  0xb8   : > { %181 = vadd.xlane.f32.xlu1 %v180_v24  ;;  %202 = vadd.xlane.f32.xlu0 %v201_v21 }
  0xbc   : > { %205 = vadd.xlane.f32.xlu0 %v204_v25 }
 0x141   : > { %v179_v26 = vpop.xlane.xlu0 %178 }
 0x142   : > { %340 = vlog2.f32 %v179_v26 }
 0x145   : > { %v182_v27 = vpop.xlane.xlu1 %181  ;;  %v203_v33 = vpop.xlane.xlu0 %202 }
 0x146   : > { %342 = vlog2.f32 %v182_v27 }
 0x149   : > { %v206_v41 = vpop.xlane.xlu0 %205 }
 0x14c   : > { %v341_v29 = vpop.eup %340 }
 0x14d   : > { %v184_v31 = vmul.f32 0.6931472, %v341_v29 }
 0x14f   : > { %v187_v34 = vadd.f32 %v184_v31, %v167_v8 }
 0x150   : > { %v343_v35 = vpop.eup %342 }
 0x151   : > { %v186_v38 = vmul.f32 0.6931472, %v343_v35  ;;  %v207_v39 = vsub.f32 %v187_v34, %v203_v33 }
 0x153   : > { %v188_v40 = vadd.f32 %v186_v38, %v170_v11  ;;  %v218_v43 = vsel %vm216_vm4, %v207_v39, 0.0 }
 0x155   : > { %v208_v42 = vsub.f32 %v188_v40, %v206_v41 }
 0x157   : > { %v219_v44 = vsel %vm217_vm5, %v208_v42, 0.0 }
 0x158   : > { %v221_v45 = vadd.f32 %v219_v44, %v218_v43 }
 0x15a   : > { %v222_v46 = vrot.slane %v221_v45, 4 }
 0x15c   : > { %v223_v47 = vadd.f32 %v222_v46, %v221_v45 }
 0x15e   : > { %v224_v48 = vrot.slane %v223_v47, 2 }
 0x160   : > { %v225_v49 = vadd.f32 %v224_v48, %v223_v47 }
 0x162   : > { %v226_v50 = vrot.slane %v225_v49, 1  ;;  %234 = sbr.rel (%p312_p5) target bundleno = 392 (0x188), region = 36 }
 0x164   : > { %v227_v52 = vadd.f32 %v226_v50, %v225_v49 }
 0x166   : > { %v228_v53 = vadd.f32 %v227_v52, %v220_v51 }
 0x168   : > { %230 = vst.msk [vmem:[#allocation2] sm:$0x1] %vm229_vm6, %v228_v53 }
 0x16f   : > { %v235_v54 = vld [vmem:[#allocation2] sm:$0x1] }
 0x170   : > { %v236_v55 = vmul.f32 0.016666668, %v235_v54 }
 0x172   : > { %v237_v56 = vsub.f32 0.0, %v236_v55 }
 0x174   : > { %v238_v57 = vmul.f32 1.442695, %v237_v56 }
 0x176   : > { %344 = vpow2.f32 %v238_v57 }
 0x180   : > { %v345_v58 = vpop.eup %344 }
 0x181   : > { %v240_v59 = vsub.f32 1.0, %v345_v58 }
 0x183   : > { %v241_v60 = vmul.f32 %v240_v59, %v240_v59 }
 0x185   : > { %v242_v61 = vmul.f32 %v241_v60, %v236_v55 }
 0x187   : > { %243 = vst.msk [vmem:[#allocation2] sm:$0x1] %vm229_vm6, %v242_v61 }
 0x188 PF: > { %p321_p6 = scmp.eq.s32.totalorder %s408_s10, 3  ;;  %s386_s20 = smov [#allocation2]  }
 0x189   : > { %s251_s21 = sshll.u32 %s386_s20, 4  ;;  %s252_s21 = int_to_ptr.vmem [resolvable:$true] %s251_s21 }
 0x18a   : > { %s346_s22 = scalar_lea.vmem %s252_s21, 16  ;;  %s352_s23 = scalar_lea.vmem %s252_s21, 32 }
 0x18b   : > { %p347_p7 = scmp.ne.s32.totalorder %s252_s21, %s346_s22  ;;  %p353_p10 = scmp.lt.s32.totalorder %s252_s21, %s252_s21 }
 0x18c   : > { %p354_p11 = scmp.lt.s32.totalorder %s352_s23, %s346_s22 }
 0x18d   : > { %p348_p8 = pnand %p347_p7, %p321_p6 }
 0x18e   : > { %p355_p12 = por %p354_p11, %p353_p10 }
 0x18f   : > { %p349_p9 = pneg %p348_p8 }
 0x191   : > { %p356_p13 = pnand %p355_p12, %p349_p9 }
 0x193   : > { %359 = shalt.err (!%p356_p13)
}
 0x194   : > { %s360_s26 = scalar_lea.hbm %s456_s2, 16 }
 0x195   : > { %p361_p0 = scmp.ne.s32.totalorder %s456_s2, %s360_s26  ;;  %p366_p3 = scmp.lt.u32.totalorder %s360_s26, %s456_s2 }
 0x197   : > { %p362_p1 = pnand %p361_p0, %p321_p6 }
 0x199   : > { %p363_p2 = pneg %p362_p1 }
 0x19b   : > { %p368_p4 = pnand %p366_p3, %p363_p2 }
 0x19d   : > { %371 = shalt.err (!%p368_p4)
}
 0x19e   : > { %318 = dma.vmem_to_hbm [thread:$0]  (%p321_p6), %s252_s21, 16, %s456_s2, [#allocation3]  }
 0x19f   : > { %377 = dma.done.wait (%p321_p6), [#allocation3], 16  }
 0x1a0   : > { %379 = vsyncadd (%p321_p6), [#allocation3], 4294967280 }
 0x1a1 PF: > { %s13_s9 = sadd.s32 1, %s382_s9  }
 0x1a2   : > { %p10_p5 = scmp.ge.s32.totalorder %s13_s9, 6  }
 0x1a4   :  { %12 = sbr.rel (!%p10_p5) target bundleno = 1 (0x1), region = 66 }
 0x1ab   :  { %264 = vsyncpa [#allocation3], 1 }
 0x1ac   :  { %266 = vsyncpa [#allocation3 + $0x1], 1 }

</bundles_post_ra>
